<compile_context>
chip_gen: v5e
topology: v5e:2x2
jax: 0.10.0
libtpu: 0.0.40
codegen_flags: <defaults>
</compile_context>

<pallas_src>
import jax
import jax.numpy as jnp
from jax.experimental import pallas as pl
from jax.experimental.pallas import tpu as pltpu  # noqa: F401  (kept for extensions)

# ---- hyperparameters (small, consistent with the forward pass) -------------
F_IN    = 4    # input feature channels
C1      = 8    # conv1 output channels
C2      = 16   # conv2 output channels == LSTM input size
HID     = 32   # LSTM hidden size
KW1     = 3    # conv1 kernel width (kernel height = 1)
N_ASSET = 8    # "height" == LSTM sequence length
WINDOW  = 16   # "width"
KW2     = WINDOW - KW1 + 1   # conv2 kernel width, collapses width to 1
WOUT    = KW2                # conv1 output width


# ---------------- fused Pallas kernel ----------------------------------------
def _fused_kernel(xcol_ref, w1_ref, b1_ref, w2_ref, b2_ref,
                  wih_ref, whh_ref, bl_ref, c_out_ref):
    """conv1+ReLU -> conv2+ReLU -> single-layer LSTM, whole batch, one grid step.

    xcol_ref: (A*N, WOUT*Cin*KW1) bf16  im2col rows ordered (asset, batch) == time-major
    w1_ref  : (WOUT*Cin*KW1, WOUT*C1) bf16  block-diagonal conv1 weight
    b1_ref  : (1, WOUT*C1) f32
    w2_ref  : (WOUT*C1, C2) bf16            conv2 weight (full-width reduction)
    b2_ref  : (1, C2) f32
    wih_ref : (C2, 4H) bf16   whh_ref: (H, 4H) f32   bl_ref: (1, 4H) f32
              (i/f/o gate columns of wih/whh/bl are pre-scaled by 0.5 at init)
    c_out   : (N, H) f32      final cell state c_T == PyTorch c_n
    """
    N, H = c_out_ref.shape
    AN = xcol_ref.shape[0]
    T = AN // N                                   # == n_asset

    # conv1 (1 x KW1) + ReLU : ONE im2col matmul over all (asset, batch, w) rows.
    h1 = jnp.maximum(
        jnp.dot(xcol_ref[...], w1_ref[...], preferred_element_type=jnp.float32)
        + b1_ref[...], 0.0)                                     # (A*N, WOUT*C1) f32

    # conv2 (1 x KW2, width -> 1) + ReLU : ONE matmul. Output already has the
    # x.transpose(1,2).squeeze(3) layout: rows = (asset, batch), cols = channels.
    h2 = jnp.maximum(
        jnp.dot(h1.astype(jnp.bfloat16), w2_ref[...],
                preferred_element_type=jnp.float32)
        + b2_ref[...], 0.0)                                     # (A*N, C2) f32

    # LSTM: hoisted input projection (+ total bias) kept as a VALUE (2 vregs).
    gx = (jnp.dot(h2.astype(jnp.bfloat16), wih_ref[...],
                  preferred_element_type=jnp.float32)
          + bl_ref[...])                                        # (A*N, 4H) f32

    whh = whh_ref[...]                                          # load once, f32
    h = jnp.zeros((N, H), jnp.float32)
    c = jnp.zeros((N, H), jnp.float32)

    # Single-tanh gate trick: i/f/o columns are pre-scaled by 0.5, so
    # sigmoid(z) = 0.5*tanh(0.5*z) + 0.5 and tanh-gate g needs no rescale.
    # => 2 EUP issues per step (tanh over (N,4H) + tanh(c)) instead of 8.
    for t in range(T):            # T == 8, statically unrolled; h/c live in vregs
        gates = gx[t * N:(t + 1) * N, :] + jnp.dot(
            h, whh, preferred_element_type=jnp.float32)         # (N, 4H)
        ta = jnp.tanh(gates)
        # PyTorch gate order: i, f, g, o
        i_g = 0.5 * ta[:, 0 * H:1 * H] + 0.5
        f_g = 0.5 * ta[:, 1 * H:2 * H] + 0.5
        g_g = ta[:, 2 * H:3 * H]
        o_g = 0.5 * ta[:, 3 * H:4 * H] + 0.5
        c = f_g * c + i_g * g_g
        h = o_g * jnp.tanh(c)
    c_out_ref[...] = c.astype(c_out_ref.dtype)


# ---------------- wrapper (jitted; im2col fused under the same jit) ----------
def _forward(x, params):
    """x: NCHW float32 (N, F_IN, N_ASSET, WINDOW). Returns (1, N, HID) == c_n."""
    N, Cin, A, W = x.shape
    Wout = W - KW1 + 1
    hid = params["whh"].shape[0]

    # im2col (pure layout plumbing on a ~4 KB array, fused by XLA under jit):
    # rows ordered (asset, batch) so the conv output is directly time-major for
    # the LSTM; columns ordered (w, cin, kw) to match the block-diagonal weight.
    taps = jnp.stack([x[:, :, :, k:k + Wout] for k in range(KW1)],
                     axis=-1)                                   # (N,Cin,A,Wout,KW1)
    x_col = jnp.transpose(taps, (2, 0, 3, 1, 4)).reshape(
        A * N, Wout * Cin * KW1).astype(jnp.bfloat16)           # (A*N, Wout*Cin*KW1)

    c_n = pl.pallas_call(
        _fused_kernel,
        out_shape=jax.ShapeDtypeStruct((N, hid), jnp.float32),
    )(x_col, params["w1_bd"], params["b1_bd"], params["w2"], params["b2"],
      params["wih"], params["whh"], params["b_lstm"])           # (N, HID)

    # PyTorch: `_, (_, output) = LSTM(x)`  =>  output = c_n, shape (1, N, HID)
    return c_n[None, :, :]


feature_extractor_forward = jax.jit(_forward)


# ---------------- deterministic parameter init -------------------------------
def init_params(key):
    ks = jax.random.split(key, 8)

    def u(k, shape, fan_in):
        bound = 1.0 / jnp.sqrt(jnp.float32(fan_in))
        return jax.random.uniform(k, shape, jnp.float32, -bound, bound)

    # conv1 weight, torch layout (C1, F_IN, 1, KW1) -> im2col matrix (F_IN*KW1, C1),
    # then block-diagonal over the WOUT width positions so conv1 is ONE matmul.
    w1_t = u(ks[0], (C1, F_IN, 1, KW1), F_IN * KW1)
    w1_mat = jnp.transpose(w1_t[:, :, 0, :], (1, 2, 0)).reshape(F_IN * KW1, C1)
    w1_bd = jnp.kron(jnp.eye(WOUT, dtype=jnp.float32), w1_mat)   # (WOUT*F_IN*KW1, WOUT*C1)
    b1 = u(ks[1], (1, C1), F_IN * KW1)
    b1_bd = jnp.tile(b1, (1, WOUT))                              # (1, WOUT*C1)

    # conv2 weight, torch layout (C2, C1, 1, KW2) -> (KW2*C1, C2) full-width reduction.
    w2_t = u(ks[2], (C2, C1, 1, KW2), C1 * KW2)
    w2 = jnp.transpose(w2_t[:, :, 0, :], (2, 1, 0)).reshape(KW2 * C1, C2)
    b2 = u(ks[3], (1, C2), C1 * KW2)

    # LSTM: torch weight_ih (4H, C2), weight_hh (4H, H), gate order [i, f, g, o].
    wih = u(ks[4], (4 * HID, C2), HID).T            # (C2, 4H)
    whh = u(ks[5], (4 * HID, HID), HID).T           # (H, 4H)
    b_ih = u(ks[6], (4 * HID,), HID)
    b_hh = u(ks[7], (4 * HID,), HID)
    b_lstm = (b_ih + b_hh)[None, :]                 # (1, 4H)

    # Fold the 0.5 pre-scale of the single-tanh sigmoid form into the i/f/o
    # gate columns (the g/cell gate keeps scale 1.0). The kernel then only
    # applies tanh + a scalar affine (0.5*t + 0.5) on those gates.
    gate_scale = jnp.full((4 * HID,), 0.5, jnp.float32).at[2 * HID:3 * HID].set(1.0)
    wih = wih * gate_scale[None, :]
    whh = whh * gate_scale[None, :]
    b_lstm = b_lstm * gate_scale[None, :]

    # Feed-forward MXU operands in bf16 (f32 accumulation in-kernel);
    # recurrent weight + biases stay f32 (gate math is f32).
    return dict(w1_bd=w1_bd.astype(jnp.bfloat16), b1_bd=b1_bd,
                w2=w2.astype(jnp.bfloat16), b2=b2,
                wih=wih.astype(jnp.bfloat16), whh=whh, b_lstm=b_lstm)


if __name__ == "__main__":
    key = jax.random.PRNGKey(0)
    kx, kp = jax.random.split(key)
    # NCHW input, matching the PyTorch conv layout.
    x = jax.random.normal(kx, (2, F_IN, N_ASSET, WINDOW), jnp.float32)
    params = init_params(kp)

    out = feature_extractor_forward(x, params)
    out = jax.block_until_ready(out)
    assert out.shape == (1, 2, HID), out.shape
    assert bool(jnp.all(jnp.isfinite(out)))
    print("KERNEL_OK")
</pallas_src>

<mosaic_0001>
module attributes {stable_mosaic.version = 11 : i64} {
  func.func @_fused_kernel(%arg0: memref<16x168xbf16, #tpu.memory_space<vmem>>, %arg1: memref<168x112xbf16, #tpu.memory_space<vmem>>, %arg2: memref<1x112xf32, #tpu.memory_space<vmem>>, %arg3: memref<112x16xbf16, #tpu.memory_space<vmem>>, %arg4: memref<1x16xf32, #tpu.memory_space<vmem>>, %arg5: memref<16x128xbf16, #tpu.memory_space<vmem>>, %arg6: memref<32x128xf32, #tpu.memory_space<vmem>>, %arg7: memref<1x128xf32, #tpu.memory_space<vmem>>, %arg8: memref<2x32xf32, #tpu.memory_space<vmem>>) attributes {dimension_semantics = [], scalar_prefetch = 0 : i64, scratch_operands = 0 : i64, tpu.core_type = #tpu.core_type<tc>} {
    %c0 = arith.constant 0 : index
    %c0_0 = arith.constant 0 : index
    %0 = vector.load %arg0[%c0, %c0_0] : memref<16x168xbf16, #tpu.memory_space<vmem>>, vector<16x168xbf16>
    %c0_1 = arith.constant 0 : index
    %c0_2 = arith.constant 0 : index
    %1 = vector.load %arg1[%c0_1, %c0_2] : memref<168x112xbf16, #tpu.memory_space<vmem>>, vector<168x112xbf16>
    %cst = arith.constant dense<0.000000e+00> : vector<16x112xf32>
    %2 = tpu.matmul %0, %1, %cst {dimension_numbers = #tpu.dot_dimension_numbers<[1], [0], [0], [1], [0, 0, 1, 1], [], []>} : vector<16x168xbf16>, vector<168x112xbf16>, vector<16x112xf32> -> vector<16x112xf32>
    %c0_3 = arith.constant 0 : index
    %c0_4 = arith.constant 0 : index
    %3 = vector.load %arg2[%c0_3, %c0_4] : memref<1x112xf32, #tpu.memory_space<vmem>>, vector<1x112xf32>
    %4 = vector.broadcast %3 : vector<1x112xf32> to vector<16x112xf32>
    %5 = arith.addf %2, %4 : vector<16x112xf32>
    %cst_5 = arith.constant 0.000000e+00 : f32
    %6 = vector.broadcast %cst_5 : f32 to vector<16x112xf32>
    %7 = arith.maximumf %5, %6 : vector<16x112xf32>
    %8 = arith.truncf %7 : vector<16x112xf32> to vector<16x112xbf16>
    %c0_6 = arith.constant 0 : index
    %c0_7 = arith.constant 0 : index
    %9 = vector.load %arg3[%c0_6, %c0_7] : memref<112x16xbf16, #tpu.memory_space<vmem>>, vector<112x16xbf16>
    %cst_8 = arith.constant dense<0.000000e+00> : vector<16x16xf32>
    %10 = tpu.matmul %8, %9, %cst_8 {dimension_numbers = #tpu.dot_dimension_numbers<[1], [0], [0], [1], [0, 0, 1, 1], [], []>} : vector<16x112xbf16>, vector<112x16xbf16>, vector<16x16xf32> -> vector<16x16xf32>
    %c0_9 = arith.constant 0 : index
    %c0_10 = arith.constant 0 : index
    %11 = vector.load %arg4[%c0_9, %c0_10] : memref<1x16xf32, #tpu.memory_space<vmem>>, vector<1x16xf32>
    %12 = vector.broadcast %11 : vector<1x16xf32> to vector<16x16xf32>
    %13 = arith.addf %10, %12 : vector<16x16xf32>
    %cst_11 = arith.constant 0.000000e+00 : f32
    %14 = vector.broadcast %cst_11 : f32 to vector<16x16xf32>
    %15 = arith.maximumf %13, %14 : vector<16x16xf32>
    %16 = arith.truncf %15 : vector<16x16xf32> to vector<16x16xbf16>
    %c0_12 = arith.constant 0 : index
    %c0_13 = arith.constant 0 : index
    %17 = vector.load %arg5[%c0_12, %c0_13] : memref<16x128xbf16, #tpu.memory_space<vmem>>, vector<16x128xbf16>
    %cst_14 = arith.constant dense<0.000000e+00> : vector<16x128xf32>
    %18 = tpu.matmul %16, %17, %cst_14 {dimension_numbers = #tpu.dot_dimension_numbers<[1], [0], [0], [1], [0, 0, 1, 1], [], []>} : vector<16x16xbf16>, vector<16x128xbf16>, vector<16x128xf32> -> vector<16x128xf32>
    %c0_15 = arith.constant 0 : index
    %c0_16 = arith.constant 0 : index
    %19 = vector.load %arg7[%c0_15, %c0_16] : memref<1x128xf32, #tpu.memory_space<vmem>>, vector<1x128xf32>
    %20 = vector.broadcast %19 : vector<1x128xf32> to vector<16x128xf32>
    %21 = arith.addf %18, %20 : vector<16x128xf32>
    %c0_17 = arith.constant 0 : index
    %c0_18 = arith.constant 0 : index
    %22 = vector.load %arg6[%c0_17, %c0_18] : memref<32x128xf32, #tpu.memory_space<vmem>>, vector<32x128xf32>
    %cst_19 = arith.constant 0.000000e+00 : f32
    %23 = vector.broadcast %cst_19 : f32 to vector<2x32xf32>
    %cst_20 = arith.constant 0.000000e+00 : f32
    %24 = vector.broadcast %cst_20 : f32 to vector<2x32xf32>
    %25 = vector.extract_strided_slice %21 {offsets = [0, 0], sizes = [2, 128], strides = [1, 1]} : vector<16x128xf32> to vector<2x128xf32>
    %cst_21 = arith.constant dense<0.000000e+00> : vector<2x128xf32>
    %26 = tpu.matmul %23, %22, %cst_21 {dimension_numbers = #tpu.dot_dimension_numbers<[1], [0], [0], [1], [0, 0, 1, 1], [], []>} : vector<2x32xf32>, vector<32x128xf32>, vector<2x128xf32> -> vector<2x128xf32>
    %27 = arith.addf %25, %26 : vector<2x128xf32>
    %28 = math.tanh %27 : vector<2x128xf32>
    %29 = vector.extract_strided_slice %28 {offsets = [0, 0], sizes = [2, 32], strides = [1, 1]} : vector<2x128xf32> to vector<2x32xf32>
    %cst_22 = arith.constant 5.000000e-01 : f32
    %30 = vector.broadcast %cst_22 : f32 to vector<2x32xf32>
    %31 = arith.mulf %30, %29 : vector<2x32xf32>
    %cst_23 = arith.constant 5.000000e-01 : f32
    %32 = vector.broadcast %cst_23 : f32 to vector<2x32xf32>
    %33 = arith.addf %31, %32 : vector<2x32xf32>
    %34 = vector.extract_strided_slice %28 {offsets = [0, 32], sizes = [2, 32], strides = [1, 1]} : vector<2x128xf32> to vector<2x32xf32>
    %cst_24 = arith.constant 5.000000e-01 : f32
    %35 = vector.broadcast %cst_24 : f32 to vector<2x32xf32>
    %36 = arith.mulf %35, %34 : vector<2x32xf32>
    %cst_25 = arith.constant 5.000000e-01 : f32
    %37 = vector.broadcast %cst_25 : f32 to vector<2x32xf32>
    %38 = arith.addf %36, %37 : vector<2x32xf32>
    %39 = vector.extract_strided_slice %28 {offsets = [0, 64], sizes = [2, 32], strides = [1, 1]} : vector<2x128xf32> to vector<2x32xf32>
    %40 = vector.extract_strided_slice %28 {offsets = [0, 96], sizes = [2, 32], strides = [1, 1]} : vector<2x128xf32> to vector<2x32xf32>
    %cst_26 = arith.constant 5.000000e-01 : f32
    %41 = vector.broadcast %cst_26 : f32 to vector<2x32xf32>
    %42 = arith.mulf %41, %40 : vector<2x32xf32>
    %cst_27 = arith.constant 5.000000e-01 : f32
    %43 = vector.broadcast %cst_27 : f32 to vector<2x32xf32>
    %44 = arith.addf %42, %43 : vector<2x32xf32>
    %45 = arith.mulf %38, %24 : vector<2x32xf32>
    %46 = arith.mulf %33, %39 : vector<2x32xf32>
    %47 = arith.addf %45, %46 : vector<2x32xf32>
    %48 = math.tanh %47 : vector<2x32xf32>
    %49 = arith.mulf %44, %48 : vector<2x32xf32>
    %50 = vector.extract_strided_slice %21 {offsets = [2, 0], sizes = [2, 128], strides = [1, 1]} : vector<16x128xf32> to vector<2x128xf32>
    %cst_28 = arith.constant dense<0.000000e+00> : vector<2x128xf32>
    %51 = tpu.matmul %49, %22, %cst_28 {dimension_numbers = #tpu.dot_dimension_numbers<[1], [0], [0], [1], [0, 0, 1, 1], [], []>} : vector<2x32xf32>, vector<32x128xf32>, vector<2x128xf32> -> vector<2x128xf32>
    %52 = arith.addf %50, %51 : vector<2x128xf32>
    %53 = math.tanh %52 : vector<2x128xf32>
    %54 = vector.extract_strided_slice %53 {offsets = [0, 0], sizes = [2, 32], strides = [1, 1]} : vector<2x128xf32> to vector<2x32xf32>
    %cst_29 = arith.constant 5.000000e-01 : f32
    %55 = vector.broadcast %cst_29 : f32 to vector<2x32xf32>
    %56 = arith.mulf %55, %54 : vector<2x32xf32>
    %cst_30 = arith.constant 5.000000e-01 : f32
    %57 = vector.broadcast %cst_30 : f32 to vector<2x32xf32>
    %58 = arith.addf %56, %57 : vector<2x32xf32>
    %59 = vector.extract_strided_slice %53 {offsets = [0, 32], sizes = [2, 32], strides = [1, 1]} : vector<2x128xf32> to vector<2x32xf32>
    %cst_31 = arith.constant 5.000000e-01 : f32
    %60 = vector.broadcast %cst_31 : f32 to vector<2x32xf32>
    %61 = arith.mulf %60, %59 : vector<2x32xf32>
    %cst_32 = arith.constant 5.000000e-01 : f32
    %62 = vector.broadcast %cst_32 : f32 to vector<2x32xf32>
    %63 = arith.addf %61, %62 : vector<2x32xf32>
    %64 = vector.extract_strided_slice %53 {offsets = [0, 64], sizes = [2, 32], strides = [1, 1]} : vector<2x128xf32> to vector<2x32xf32>
    %65 = vector.extract_strided_slice %53 {offsets = [0, 96], sizes = [2, 32], strides = [1, 1]} : vector<2x128xf32> to vector<2x32xf32>
    %cst_33 = arith.constant 5.000000e-01 : f32
    %66 = vector.broadcast %cst_33 : f32 to vector<2x32xf32>
    %67 = arith.mulf %66, %65 : vector<2x32xf32>
    %cst_34 = arith.constant 5.000000e-01 : f32
    %68 = vector.broadcast %cst_34 : f32 to vector<2x32xf32>
    %69 = arith.addf %67, %68 : vector<2x32xf32>
    %70 = arith.mulf %63, %47 : vector<2x32xf32>
    %71 = arith.mulf %58, %64 : vector<2x32xf32>
    %72 = arith.addf %70, %71 : vector<2x32xf32>
    %73 = math.tanh %72 : vector<2x32xf32>
    %74 = arith.mulf %69, %73 : vector<2x32xf32>
    %75 = vector.extract_strided_slice %21 {offsets = [4, 0], sizes = [2, 128], strides = [1, 1]} : vector<16x128xf32> to vector<2x128xf32>
    %cst_35 = arith.constant dense<0.000000e+00> : vector<2x128xf32>
    %76 = tpu.matmul %74, %22, %cst_35 {dimension_numbers = #tpu.dot_dimension_numbers<[1], [0], [0], [1], [0, 0, 1, 1], [], []>} : vector<2x32xf32>, vector<32x128xf32>, vector<2x128xf32> -> vector<2x128xf32>
    %77 = arith.addf %75, %76 : vector<2x128xf32>
    %78 = math.tanh %77 : vector<2x128xf32>
    %79 = vector.extract_strided_slice %78 {offsets = [0, 0], sizes = [2, 32], strides = [1, 1]} : vector<2x128xf32> to vector<2x32xf32>
    %cst_36 = arith.constant 5.000000e-01 : f32
    %80 = vector.broadcast %cst_36 : f32 to vector<2x32xf32>
    %81 = arith.mulf %80, %79 : vector<2x32xf32>
    %cst_37 = arith.constant 5.000000e-01 : f32
    %82 = vector.broadcast %cst_37 : f32 to vector<2x32xf32>
    %83 = arith.addf %81, %82 : vector<2x32xf32>
    %84 = vector.extract_strided_slice %78 {offsets = [0, 32], sizes = [2, 32], strides = [1, 1]} : vector<2x128xf32> to vector<2x32xf32>
    %cst_38 = arith.constant 5.000000e-01 : f32
    %85 = vector.broadcast %cst_38 : f32 to vector<2x32xf32>
    %86 = arith.mulf %85, %84 : vector<2x32xf32>
    %cst_39 = arith.constant 5.000000e-01 : f32
    %87 = vector.broadcast %cst_39 : f32 to vector<2x32xf32>
    %88 = arith.addf %86, %87 : vector<2x32xf32>
    %89 = vector.extract_strided_slice %78 {offsets = [0, 64], sizes = [2, 32], strides = [1, 1]} : vector<2x128xf32> to vector<2x32xf32>
    %90 = vector.extract_strided_slice %78 {offsets = [0, 96], sizes = [2, 32], strides = [1, 1]} : vector<2x128xf32> to vector<2x32xf32>
    %cst_40 = arith.constant 5.000000e-01 : f32
    %91 = vector.broadcast %cst_40 : f32 to vector<2x32xf32>
    %92 = arith.mulf %91, %90 : vector<2x32xf32>
    %cst_41 = arith.constant 5.000000e-01 : f32
    %93 = vector.broadcast %cst_41 : f32 to vector<2x32xf32>
    %94 = arith.addf %92, %93 : vector<2x32xf32>
    %95 = arith.mulf %88, %72 : vector<2x32xf32>
    %96 = arith.mulf %83, %89 : vector<2x32xf32>
    %97 = arith.addf %95, %96 : vector<2x32xf32>
    %98 = math.tanh %97 : vector<2x32xf32>
    %99 = arith.mulf %94, %98 : vector<2x32xf32>
    %100 = vector.extract_strided_slice %21 {offsets = [6, 0], sizes = [2, 128], strides = [1, 1]} : vector<16x128xf32> to vector<2x128xf32>
    %cst_42 = arith.constant dense<0.000000e+00> : vector<2x128xf32>
    %101 = tpu.matmul %99, %22, %cst_42 {dimension_numbers = #tpu.dot_dimension_numbers<[1], [0], [0], [1], [0, 0, 1, 1], [], []>} : vector<2x32xf32>, vector<32x128xf32>, vector<2x128xf32> -> vector<2x128xf32>
    %102 = arith.addf %100, %101 : vector<2x128xf32>
    %103 = math.tanh %102 : vector<2x128xf32>
    %104 = vector.extract_strided_slice %103 {offsets = [0, 0], sizes = [2, 32], strides = [1, 1]} : vector<2x128xf32> to vector<2x32xf32>
    %cst_43 = arith.constant 5.000000e-01 : f32
    %105 = vector.broadcast %cst_43 : f32 to vector<2x32xf32>
    %106 = arith.mulf %105, %104 : vector<2x32xf32>
    %cst_44 = arith.constant 5.000000e-01 : f32
    %107 = vector.broadcast %cst_44 : f32 to vector<2x32xf32>
    %108 = arith.addf %106, %107 : vector<2x32xf32>
    %109 = vector.extract_strided_slice %103 {offsets = [0, 32], sizes = [2, 32], strides = [1, 1]} : vector<2x128xf32> to vector<2x32xf32>
    %cst_45 = arith.constant 5.000000e-01 : f32
    %110 = vector.broadcast %cst_45 : f32 to vector<2x32xf32>
    %111 = arith.mulf %110, %109 : vector<2x32xf32>
    %cst_46 = arith.constant 5.000000e-01 : f32
    %112 = vector.broadcast %cst_46 : f32 to vector<2x32xf32>
    %113 = arith.addf %111, %112 : vector<2x32xf32>
    %114 = vector.extract_strided_slice %103 {offsets = [0, 64], sizes = [2, 32], strides = [1, 1]} : vector<2x128xf32> to vector<2x32xf32>
    %115 = vector.extract_strided_slice %103 {offsets = [0, 96], sizes = [2, 32], strides = [1, 1]} : vector<2x128xf32> to vector<2x32xf32>
    %cst_47 = arith.constant 5.000000e-01 : f32
    %116 = vector.broadcast %cst_47 : f32 to vector<2x32xf32>
    %117 = arith.mulf %116, %115 : vector<2x32xf32>
    %cst_48 = arith.constant 5.000000e-01 : f32
    %118 = vector.broadcast %cst_48 : f32 to vector<2x32xf32>
    %119 = arith.addf %117, %118 : vector<2x32xf32>
    %120 = arith.mulf %113, %97 : vector<2x32xf32>
    %121 = arith.mulf %108, %114 : vector<2x32xf32>
    %122 = arith.addf %120, %121 : vector<2x32xf32>
    %123 = math.tanh %122 : vector<2x32xf32>
    %124 = arith.mulf %119, %123 : vector<2x32xf32>
    %125 = vector.extract_strided_slice %21 {offsets = [8, 0], sizes = [2, 128], strides = [1, 1]} : vector<16x128xf32> to vector<2x128xf32>
    %cst_49 = arith.constant dense<0.000000e+00> : vector<2x128xf32>
    %126 = tpu.matmul %124, %22, %cst_49 {dimension_numbers = #tpu.dot_dimension_numbers<[1], [0], [0], [1], [0, 0, 1, 1], [], []>} : vector<2x32xf32>, vector<32x128xf32>, vector<2x128xf32> -> vector<2x128xf32>
    %127 = arith.addf %125, %126 : vector<2x128xf32>
    %128 = math.tanh %127 : vector<2x128xf32>
    %129 = vector.extract_strided_slice %128 {offsets = [0, 0], sizes = [2, 32], strides = [1, 1]} : vector<2x128xf32> to vector<2x32xf32>
    %cst_50 = arith.constant 5.000000e-01 : f32
    %130 = vector.broadcast %cst_50 : f32 to vector<2x32xf32>
    %131 = arith.mulf %130, %129 : vector<2x32xf32>
    %cst_51 = arith.constant 5.000000e-01 : f32
    %132 = vector.broadcast %cst_51 : f32 to vector<2x32xf32>
    %133 = arith.addf %131, %132 : vector<2x32xf32>
    %134 = vector.extract_strided_slice %128 {offsets = [0, 32], sizes = [2, 32], strides = [1, 1]} : vector<2x128xf32> to vector<2x32xf32>
    %cst_52 = arith.constant 5.000000e-01 : f32
    %135 = vector.broadcast %cst_52 : f32 to vector<2x32xf32>
    %136 = arith.mulf %135, %134 : vector<2x32xf32>
    %cst_53 = arith.constant 5.000000e-01 : f32
    %137 = vector.broadcast %cst_53 : f32 to vector<2x32xf32>
    %138 = arith.addf %136, %137 : vector<2x32xf32>
    %139 = vector.extract_strided_slice %128 {offsets = [0, 64], sizes = [2, 32], strides = [1, 1]} : vector<2x128xf32> to vector<2x32xf32>
    %140 = vector.extract_strided_slice %128 {offsets = [0, 96], sizes = [2, 32], strides = [1, 1]} : vector<2x128xf32> to vector<2x32xf32>
    %cst_54 = arith.constant 5.000000e-01 : f32
    %141 = vector.broadcast %cst_54 : f32 to vector<2x32xf32>
    %142 = arith.mulf %141, %140 : vector<2x32xf32>
    %cst_55 = arith.constant 5.000000e-01 : f32
    %143 = vector.broadcast %cst_55 : f32 to vector<2x32xf32>
    %144 = arith.addf %142, %143 : vector<2x32xf32>
    %145 = arith.mulf %138, %122 : vector<2x32xf32>
    %146 = arith.mulf %133, %139 : vector<2x32xf32>
    %147 = arith.addf %145, %146 : vector<2x32xf32>
    %148 = math.tanh %147 : vector<2x32xf32>
    %149 = arith.mulf %144, %148 : vector<2x32xf32>
    %150 = vector.extract_strided_slice %21 {offsets = [10, 0], sizes = [2, 128], strides = [1, 1]} : vector<16x128xf32> to vector<2x128xf32>
    %cst_56 = arith.constant dense<0.000000e+00> : vector<2x128xf32>
    %151 = tpu.matmul %149, %22, %cst_56 {dimension_numbers = #tpu.dot_dimension_numbers<[1], [0], [0], [1], [0, 0, 1, 1], [], []>} : vector<2x32xf32>, vector<32x128xf32>, vector<2x128xf32> -> vector<2x128xf32>
    %152 = arith.addf %150, %151 : vector<2x128xf32>
    %153 = math.tanh %152 : vector<2x128xf32>
    %154 = vector.extract_strided_slice %153 {offsets = [0, 0], sizes = [2, 32], strides = [1, 1]} : vector<2x128xf32> to vector<2x32xf32>
    %cst_57 = arith.constant 5.000000e-01 : f32
    %155 = vector.broadcast %cst_57 : f32 to vector<2x32xf32>
    %156 = arith.mulf %155, %154 : vector<2x32xf32>
    %cst_58 = arith.constant 5.000000e-01 : f32
    %157 = vector.broadcast %cst_58 : f32 to vector<2x32xf32>
    %158 = arith.addf %156, %157 : vector<2x32xf32>
    %159 = vector.extract_strided_slice %153 {offsets = [0, 32], sizes = [2, 32], strides = [1, 1]} : vector<2x128xf32> to vector<2x32xf32>
    %cst_59 = arith.constant 5.000000e-01 : f32
    %160 = vector.broadcast %cst_59 : f32 to vector<2x32xf32>
    %161 = arith.mulf %160, %159 : vector<2x32xf32>
    %cst_60 = arith.constant 5.000000e-01 : f32
    %162 = vector.broadcast %cst_60 : f32 to vector<2x32xf32>
    %163 = arith.addf %161, %162 : vector<2x32xf32>
    %164 = vector.extract_strided_slice %153 {offsets = [0, 64], sizes = [2, 32], strides = [1, 1]} : vector<2x128xf32> to vector<2x32xf32>
    %165 = vector.extract_strided_slice %153 {offsets = [0, 96], sizes = [2, 32], strides = [1, 1]} : vector<2x128xf32> to vector<2x32xf32>
    %cst_61 = arith.constant 5.000000e-01 : f32
    %166 = vector.broadcast %cst_61 : f32 to vector<2x32xf32>
    %167 = arith.mulf %166, %165 : vector<2x32xf32>
    %cst_62 = arith.constant 5.000000e-01 : f32
    %168 = vector.broadcast %cst_62 : f32 to vector<2x32xf32>
    %169 = arith.addf %167, %168 : vector<2x32xf32>
    %170 = arith.mulf %163, %147 : vector<2x32xf32>
    %171 = arith.mulf %158, %164 : vector<2x32xf32>
    %172 = arith.addf %170, %171 : vector<2x32xf32>
    %173 = math.tanh %172 : vector<2x32xf32>
    %174 = arith.mulf %169, %173 : vector<2x32xf32>
    %175 = vector.extract_strided_slice %21 {offsets = [12, 0], sizes = [2, 128], strides = [1, 1]} : vector<16x128xf32> to vector<2x128xf32>
    %cst_63 = arith.constant dense<0.000000e+00> : vector<2x128xf32>
    %176 = tpu.matmul %174, %22, %cst_63 {dimension_numbers = #tpu.dot_dimension_numbers<[1], [0], [0], [1], [0, 0, 1, 1], [], []>} : vector<2x32xf32>, vector<32x128xf32>, vector<2x128xf32> -> vector<2x128xf32>
    %177 = arith.addf %175, %176 : vector<2x128xf32>
    %178 = math.tanh %177 : vector<2x128xf32>
    %179 = vector.extract_strided_slice %178 {offsets = [0, 0], sizes = [2, 32], strides = [1, 1]} : vector<2x128xf32> to vector<2x32xf32>
    %cst_64 = arith.constant 5.000000e-01 : f32
    %180 = vector.broadcast %cst_64 : f32 to vector<2x32xf32>
    %181 = arith.mulf %180, %179 : vector<2x32xf32>
    %cst_65 = arith.constant 5.000000e-01 : f32
    %182 = vector.broadcast %cst_65 : f32 to vector<2x32xf32>
    %183 = arith.addf %181, %182 : vector<2x32xf32>
    %184 = vector.extract_strided_slice %178 {offsets = [0, 32], sizes = [2, 32], strides = [1, 1]} : vector<2x128xf32> to vector<2x32xf32>
    %cst_66 = arith.constant 5.000000e-01 : f32
    %185 = vector.broadcast %cst_66 : f32 to vector<2x32xf32>
    %186 = arith.mulf %185, %184 : vector<2x32xf32>
    %cst_67 = arith.constant 5.000000e-01 : f32
    %187 = vector.broadcast %cst_67 : f32 to vector<2x32xf32>
    %188 = arith.addf %186, %187 : vector<2x32xf32>
    %189 = vector.extract_strided_slice %178 {offsets = [0, 64], sizes = [2, 32], strides = [1, 1]} : vector<2x128xf32> to vector<2x32xf32>
    %190 = vector.extract_strided_slice %178 {offsets = [0, 96], sizes = [2, 32], strides = [1, 1]} : vector<2x128xf32> to vector<2x32xf32>
    %cst_68 = arith.constant 5.000000e-01 : f32
    %191 = vector.broadcast %cst_68 : f32 to vector<2x32xf32>
    %192 = arith.mulf %191, %190 : vector<2x32xf32>
    %cst_69 = arith.constant 5.000000e-01 : f32
    %193 = vector.broadcast %cst_69 : f32 to vector<2x32xf32>
    %194 = arith.addf %192, %193 : vector<2x32xf32>
    %195 = arith.mulf %188, %172 : vector<2x32xf32>
    %196 = arith.mulf %183, %189 : vector<2x32xf32>
    %197 = arith.addf %195, %196 : vector<2x32xf32>
    %198 = math.tanh %197 : vector<2x32xf32>
    %199 = arith.mulf %194, %198 : vector<2x32xf32>
    %200 = vector.extract_strided_slice %21 {offsets = [14, 0], sizes = [2, 128], strides = [1, 1]} : vector<16x128xf32> to vector<2x128xf32>
    %cst_70 = arith.constant dense<0.000000e+00> : vector<2x128xf32>
    %201 = tpu.matmul %199, %22, %cst_70 {dimension_numbers = #tpu.dot_dimension_numbers<[1], [0], [0], [1], [0, 0, 1, 1], [], []>} : vector<2x32xf32>, vector<32x128xf32>, vector<2x128xf32> -> vector<2x128xf32>
    %202 = arith.addf %200, %201 : vector<2x128xf32>
    %203 = math.tanh %202 : vector<2x128xf32>
    %204 = vector.extract_strided_slice %203 {offsets = [0, 0], sizes = [2, 32], strides = [1, 1]} : vector<2x128xf32> to vector<2x32xf32>
    %cst_71 = arith.constant 5.000000e-01 : f32
    %205 = vector.broadcast %cst_71 : f32 to vector<2x32xf32>
    %206 = arith.mulf %205, %204 : vector<2x32xf32>
    %cst_72 = arith.constant 5.000000e-01 : f32
    %207 = vector.broadcast %cst_72 : f32 to vector<2x32xf32>
    %208 = arith.addf %206, %207 : vector<2x32xf32>
    %209 = vector.extract_strided_slice %203 {offsets = [0, 32], sizes = [2, 32], strides = [1, 1]} : vector<2x128xf32> to vector<2x32xf32>
    %cst_73 = arith.constant 5.000000e-01 : f32
    %210 = vector.broadcast %cst_73 : f32 to vector<2x32xf32>
    %211 = arith.mulf %210, %209 : vector<2x32xf32>
    %cst_74 = arith.constant 5.000000e-01 : f32
    %212 = vector.broadcast %cst_74 : f32 to vector<2x32xf32>
    %213 = arith.addf %211, %212 : vector<2x32xf32>
    %214 = vector.extract_strided_slice %203 {offsets = [0, 64], sizes = [2, 32], strides = [1, 1]} : vector<2x128xf32> to vector<2x32xf32>
    %215 = arith.mulf %213, %197 : vector<2x32xf32>
    %216 = arith.mulf %208, %214 : vector<2x32xf32>
    %217 = arith.addf %215, %216 : vector<2x32xf32>
    %c0_75 = arith.constant 0 : index
    %c0_76 = arith.constant 0 : index
    %218 = vector.load %arg8[%c0_75, %c0_76] : memref<2x32xf32, #tpu.memory_space<vmem>>, vector<2x32xf32>
    tpu.vector_store %arg8[%c0_75, %c0_76], %217 {strides = array<i32>} : memref<2x32xf32, #tpu.memory_space<vmem>>, vector<2x32xf32>,
    return
  }
}

</mosaic_0001>

<bundles_post_ra>
// kernel: _forward.1
= control target key start
LH: loop header
LB: loop body
LE: loop exit
PB: predicated region body
PF: predicated region fallthrough
CT: control target
= control target key end

     0   :  { %vm134_vm0 = vcmask 1043456   ;;  %s1117_s0 = inlined_call_operand.vmem [shape: bf16[16,168], index: 0, kind: input, shape index: {}]   ;;  %s1118_s1 = inlined_call_operand.vmem [shape: bf16[168,112], index: 1, kind: input, shape index: {}]   ;;  %s1119_s2 = inlined_call_operand.vmem [shape: f32[1,112], index: 2, kind: input, shape index: {}]   ;;  %s1120_s3 = inlined_call_operand.vmem [shape: bf16[112,16], index: 3, kind: input, shape index: {}]   ;;  %s1121_s4 = inlined_call_operand.vmem [shape: f32[1,16], index: 4, kind: input, shape index: {}]   ;;  %s1122_s5 = inlined_call_operand.vmem [shape: bf16[16,128], index: 5, kind: input, shape index: {}]   ;;  %s1123_s6 = inlined_call_operand.vmem [shape: f32[32,128], index: 6, kind: input, shape index: {}]   ;;  %s1124_s7 = inlined_call_operand.vmem [shape: f32[1,128], index: 7, kind: input, shape index: {}]   ;;  %s1125_s8 = inlined_call_operand.hbm [shape: f32[2,32], index: 8, kind: output, shape index: {}]  }
   0x1   :  { %v810_v0 = vld [vmem:[%s1118_s1 + $0x38] sm:$0xff]  ;;  %v53_v1 = vld [vmem:[%s1118_s1 + $0x50] sm:$0xf]  ;;  %v808_v6 = vld [vmem:[%s1118_s1 + $0x28] sm:$0xff] }
   0x2   :  { %138 = vmatpush.bf16.msra.mxu0 %v810_v0  ;;  %v809_v2 = vld [vmem:[%s1118_s1 + $0x30] sm:$0xff]  ;;  %v108_v3 = vunpack.c.l.b16 %v53_v1 }
   0x3   :  { %v819_v5 = vld [vmem:[%s1120_s3 + $0x30] sm:$0xff] }
   0x4   :  { %v119_v4 = vpack.c.b16 %v108_v3, %v108_v3 }
   0x6   :  { %139 = vmatpush.bf16.msra.mxu0 %v809_v2  ;;  %v136_v7 = vsel %vm134_vm0, %v119_v4, 0 }
   0x7   :  { %13 = vsyncpa [#allocation3], 0  ;;  %157 = vmatpush.bf16.msra.mxu1 %v136_v7  ;;  %v812_v8 = vld [vmem:[%s1118_s1 + $0x48] sm:$0xff]  ;;  %234 = vmatpush.bf16.msra.mxu2 %v819_v5  ;;  %v807_v9 = vld [vmem:[%s1118_s1 + $0x20] sm:$0xff]  ;;  %vm130_vm1 = vcmask 326656   ;;  %vm229_vm2 = vcmask 916480  }
   0x8   :  { %v811_v10 = vld [vmem:[%s1118_s1 + $0x40] sm:$0xff]  ;;  %v715_v12 = vld [vmem:[%s1117_s0 + $0x8] sm:$0xf0]  ;;  %v806_v13 = vld [vmem:[%s1118_s1 + $0x18] sm:$0xff]  ;;  %vm262_vm3 = vcmask 130048   ;;  %v885_v52 = vmov 0.0  }
   0x9   :  { %v801_v11 = vld [vmem:[%s1117_s0 + $0x4] sm:$0xf]  ;;  %v805_v15 = vld [vmem:[%s1118_s1 + $0x10] sm:$0xff]  ;;  %v804_v16 = vld [vmem:[%s1118_s1 + $0x8] sm:$0xff]  ;;  %s886_s14 = smov 64   ;;  %s887_s15 = smov 32  }
   0xa   :  { %140 = vmatpush.bf16.msra.mxu0 %v808_v6  ;;  %v718_v14 = vor.u32 %v801_v11, %v715_v12  ;;  %v803_v17 = vld [vmem:[%s1118_s1] sm:$0xff]  ;;  %v802_v19 = vld [vmem:[%s1117_s0 + $0x4] sm:$0xf0]  ;;  %v816_v23 = vld [vmem:[%s1120_s3 + $0x18] sm:$0xff]  ;;  %vm284_vm4 = vcmask 261120   ;;  %s889_s16 = smov [#allocation2]  }
   0xb   :  { %158 = vmatpush.bf16.msra.mxu1 %v812_v8  ;;  %v713_v18 = vld [vmem:[%s1117_s0] sm:$0xf]  ;;  %v818_v21 = vld [vmem:[%s1120_s3 + $0x28] sm:$0xff]  ;;  %v815_v24 = vld [vmem:[%s1120_s3 + $0x10] sm:$0xff]  ;;  %s700_s17 = sshll.u32 %s889_s16, 4  ;;  %s702_s19 = sshll.u32 %s1125_s8, 4  ;;  %s701_s17 = int_to_ptr.vmem [resolvable:$true] %s700_s17  ;;  %s703_s19 = int_to_ptr.hbm [resolvable:$true] %s702_s19 }
   0xc   :  { %v714_v20 = vor.u32 %v802_v19, %v713_v18  ;;  %235 = vmatpush.bf16.msra.mxu2 %v818_v21  ;;  %v817_v22 = vld [vmem:[%s1120_s3 + $0x20] sm:$0xff]  ;;  %v814_v25 = vld [vmem:[%s1120_s3 + $0x8] sm:$0xff]  ;;  %v1010_v40 = vld [vmem:[%s1123_s6 + $0x18] sm:$0xff]  ;;  %vm693_vm5 = vcmask 261126  }
   0xd   :  { %v813_v26 = vld [vmem:[%s1120_s3] sm:$0xff]  ;;  %v1015_v41 = vld [vmem:[%s1123_s6 + $0x10] sm:$0xff]  ;;  %v1022_v42 = vld [vmem:[%s1123_s6 + $0x8] sm:$0xff] }
   0xe   :  { %141 = vmatpush.bf16.msra.mxu0 %v807_v9  ;;  %v826_v29 = vld [vmem:[%s1119_s2] ss:$0 sm:$0xff] }
   0xf   :  { %159 = vmatpush.bf16.msra.mxu1 %v811_v10  ;;  %v820_v39 = vld [vmem:[%s1122_s5] sm:$0xff] }
  0x10   :  { %236 = vmatpush.bf16.msra.mxu2 %v817_v22  ;;  %273 = vmatpush.bf16.msra.mxu3 %v820_v39  ;;  %v1030_v43 = vld [vmem:[%s1123_s6] sm:$0xff] }
  0x11   :  { %v827_v45 = vld [vmem:[%s1121_s4] ss:$0 sm:$0xff] }
  0x12   :  { %142 = vmatpush.bf16.msra.mxu0 %v806_v13  ;;  %759 = vmatmul.msk.bf16.vlgmr.msra.gmra.mxu1 %vm130_vm1, %v718_v14  ;;  %v828_v54 = vld [vmem:[%s1124_s7] ss:$0 sm:$0xff]  ;;  %s888_s7 = smov 96  }
  0x13   :  { %346 = vmatpush.msrb.mxu1 %v1010_v40 }
  0x14   :  { %237 = vmatpush.bf16.msra.mxu2 %v816_v23  ;;  %300 = vmatpush.msrb.mxu3 %v1010_v40 }
  0x15   :  { %347 = vmatpush.msrb.mxu1 %v1015_v41 }
  0x16   :  { %143 = vmatpush.bf16.msra.mxu0 %v805_v15  ;;  %301 = vmatpush.msrb.mxu3 %v1015_v41 }
  0x17   :  { %348 = vmatpush.msrb.mxu1 %v1022_v42 }
  0x18   :  { %238 = vmatpush.bf16.msra.mxu2 %v815_v24  ;;  %302 = vmatpush.msrb.mxu3 %v1022_v42 }
  0x19   :  { %349 = vmatpush.msrb.mxu1 %v1030_v43 }
  0x1a   :  { %144 = vmatpush.bf16.msra.mxu0 %v804_v16  ;;  %303 = vmatpush.msrb.mxu3 %v1030_v43 }
  0x1b   :  { %452 = vmatpush.msra.mxu1 %v1010_v40 }
  0x1c   :  { %239 = vmatpush.bf16.msra.mxu2 %v814_v25 }
  0x1d   :  { %453 = vmatpush.msra.mxu1 %v1015_v41 }
  0x1e   :  { %145 = vmatpush.bf16.msra.mxu0 %v803_v17 }
  0x1f   :  { %454 = vmatpush.msra.mxu1 %v1022_v42 }
  0x20   :  { %240 = vmatpush.bf16.msra.mxu2 %v813_v26 }
  0x21   :  { %146 = vmatmul.bf16.vlgmr.msra.gmra.mxu0 %v714_v20  ;;  %455 = vmatpush.msra.mxu1 %v1030_v43 }
  0x24   :  { %607 = vmatpush.msrb.mxu2 %v1010_v40 }
  0x26   :  { %608 = vmatpush.msrb.mxu2 %v1015_v41 }
  0x28   :  { %609 = vmatpush.msrb.mxu2 %v1022_v42 }
  0x2a   :  { %610 = vmatpush.msrb.mxu2 %v1030_v43 }
  0x8f   :  { %v161_v27 = vpop.f32.mrf.mxu1 }
  0x97   :  { %v163_v34 = vpop.f32.mrf.mxu1 }
  0x9e   :  { %v147_v28 = vpop.f32.mrf.mxu0 }
  0x9f   :  { %v148_v30 = vadd.f32 %v826_v29, %v147_v28 }
  0xa1   :  { %v162_v32 = vadd.f32 %v161_v27, %v148_v30 }
  0xa3   :  { %v166_v36 = vmax.f32 %v162_v32, 0.0 }
  0xa6   :  { %v149_v31 = vpop.f32.mrf.mxu0 }
  0xa7   :  { %v150_v33 = vadd.f32 %v826_v29, %v149_v31 }
  0xa9   :  { %v164_v35 = vadd.f32 %v163_v34, %v150_v33 }
  0xab   :  { %v167_v37 = vmax.f32 %v164_v35, 0.0 }
  0xad   :  { %v168_v38 = vpack.c.bf16 %v167_v37, %v166_v36 }
  0xaf   :  { %788 = vmatmul.msk.bf16.vlgmr.msra.gmra.mxu2 %vm229_vm2, %v168_v38 }
 0x132   :  { %v242_v44 = vpop.f32.mrf.mxu2 }
 0x133   :  { %v243_v46 = vadd.f32 %v827_v45, %v242_v44 }
 0x135   :  { %v247_v49 = vmax.f32 %v243_v46, 0.0 }
 0x13a   :  { %v244_v47 = vpop.f32.mrf.mxu2 }
 0x13b   :  { %v245_v48 = vadd.f32 %v827_v45, %v244_v47 }
 0x13d   :  { %v248_v50 = vmax.f32 %v245_v48, 0.0 }
 0x13f   :  { %v249_v51 = vpack.c.bf16 %v248_v50, %v247_v49 }
 0x141   :  { %793 = vmatmul.msk.bf16.vlgmr.msra.gmra.mxu3 %vm262_vm3, %v249_v51 }
 0x142   :  { %399 = vmatpush.msra.mxu3 %v1010_v40 }
 0x144   :  { %400 = vmatpush.msra.mxu3 %v1015_v41 }
 0x146   :  { %401 = vmatpush.msra.mxu3 %v1022_v42 }
 0x148   :  { %402 = vmatpush.msra.mxu3 %v1030_v43 }
 0x151   :  { %304 = vmatmul.f32.vlgmr.msrb.gmra.mxu3 %v885_v52 }
 0x152   :  { %505 = vmatpush.msrb.mxu3 %v1010_v40 }
 0x154   :  { %506 = vmatpush.msrb.mxu3 %v1015_v41 }
 0x156   :  { %507 = vmatpush.msrb.mxu3 %v1022_v42 }
 0x158   :  { %508 = vmatpush.msrb.mxu3 %v1030_v43 }
 0x1c4   :  { %v275_v53 = vpop.f32.mrf.mxu3 }
 0x1c5   :  { %v1059_v57 = vadd.f32 %v828_v54, %v275_v53 }
 0x1cc   :  { %v277_v55 = vpop.f32.mrf.mxu3 }
 0x1cd   :  { %v1057_v56 = vadd.f32 %v828_v54, %v277_v55 }
 0x1d4   :  { %v305_v58 = vpop.f32.mrf.mxu3 }
 0x1d5   :  { %v308_v59 = vadd.f32 %v305_v58, %v1059_v57 }
 0x1d7   :  { %829 = vtanh.f32 %v308_v59 }
 0x1dd   :  { %v830_v60 = vpop.eup %829 }
 0x1de   :  { %314 = vrot.lane.b32.xlu0 %v830_v60, %s886_s14  ;;  %v310_v61 = vmul.f32 0.5, %v830_v60 }
 0x1e0   :  { %v311_v62 = vadd.f32 0.5, %v310_v61 }
 0x1e2   :  { %v312_v1 = vmul.f32 0.0, %v311_v62 }
 0x250   :  { %v315_v63 = vpop.permute.xlu0 %314 }
 0x251   :  { %v317_v0 = vmul.f32 %v315_v63, %v311_v62 }
 0x253   :  { %319 = vrot.lane.b32.xlu0 %v317_v0, %s887_s15 }
 0x2c5   :  { %v320_v2 = vpop.permute.xlu0 %319 }
 0x2c6   :  { %v322_v3 = vadd.f32 %v320_v2, %v312_v1 }
 0x2c8   :  { %831 = vtanh.f32 %v322_v3  ;;  %v362_v16 = vrot.slane %v322_v3, 6 }
 0x2ce   :  { %v832_v4 = vpop.eup %831 }
 0x2cf   :  { %325 = vrot.lane.b32.xlu1 %v832_v4, %s886_s14 }
 0x341   :  { %v326_v5 = vpop.permute.xlu1 %325 }
 0x342   :  { %v328_v6 = vmul.f32 %v326_v5, %v311_v62 }
 0x344   :  { %330 = vrot.lane.b32.xlu1 %v328_v6, %s887_s15 }
 0x3b6   :  { %v331_v7 = vpop.permute.xlu1 %330 }
 0x3b7   :  { %794 = vmatmul.msk.f32.vlgmr.msrb.gmra.mxu1 %vm284_vm4, %v331_v7 }
 0x3b8   :  { %554 = vmatpush.msrb.mxu1 %v1010_v40 }
 0x3ba   :  { %555 = vmatpush.msrb.mxu1 %v1015_v41 }
 0x3bc   :  { %556 = vmatpush.msrb.mxu1 %v1022_v42 }
 0x3be   :  { %557 = vmatpush.msrb.mxu1 %v1030_v43 }
 0x434   :  { %v351_v8 = vpop.f32.mrf.mxu1 }
 0x435   :  { %v355_v9 = vrot.slane %v351_v8, 6 }
 0x437   :  { %v357_v10 = vadd.f32 %v355_v9, %v1059_v57 }
 0x439   :  { %833 = vtanh.f32 %v357_v10 }
 0x43f   :  { %v834_v11 = vpop.eup %833 }
 0x440   :  { %366 = vrot.lane.b32.xlu2 %v834_v11, %s886_s14  ;;  %v359_v12 = vmul.f32 0.5, %v834_v11 }
 0x442   :  { %v360_v13 = vadd.f32 0.5, %v359_v12 }
 0x444   :  { %v364_v17 = vmul.f32 %v362_v16, %v360_v13 }
 0x49a   :  { %v367_v14 = vpop.permute.xlu2 %366 }
 0x49b   :  { %v369_v15 = vmul.f32 %v367_v14, %v360_v13 }
 0x49d   :  { %371 = vrot.lane.b32.xlu2 %v369_v15, %s887_s15 }
 0x4f7   :  { %v372_v18 = vpop.permute.xlu2 %371 }
 0x4f8   :  { %v374_v19 = vadd.f32 %v372_v18, %v364_v17 }
 0x4fa   :  { %835 = vtanh.f32 %v374_v19  ;;  %v415_v33 = vrot.slane %v374_v19, 6 }
 0x500   :  { %v836_v20 = vpop.eup %835 }
 0x501   :  { %377 = vrot.lane.b32.xlu0 %v836_v20, %s886_s14 }
 0x573   :  { %v378_v21 = vpop.permute.xlu0 %377 }
 0x574   :  { %v380_v22 = vmul.f32 %v378_v21, %v360_v13 }
 0x576   :  { %v382_v23 = vrot.slane %v380_v22, 2 }
 0x578   :  { %383 = vrot.lane.b32.xlu1 %v382_v23, %s887_s15 }
 0x5ea   :  { %v384_v24 = vpop.permute.xlu1 %383 }
 0x5eb   :  { %795 = vmatmul.msk.f32.vlgmr.msra.gmra.mxu3 %vm284_vm4, %v384_v24 }
 0x5ec   :  { %660 = vmatpush.msra.mxu3 %v1010_v40 }
 0x5ee   :  { %661 = vmatpush.msra.mxu3 %v1015_v41 }
 0x5f0   :  { %662 = vmatpush.msra.mxu3 %v1022_v42 }
 0x5f2   :  { %663 = vmatpush.msra.mxu3 %v1030_v43 }
 0x66e   :  { %v404_v25 = vpop.f32.mrf.mxu3 }
 0x66f   :  { %v408_v26 = vrot.slane %v404_v25, 4 }
 0x671   :  { %v410_v27 = vadd.f32 %v408_v26, %v1059_v57 }
 0x673   :  { %837 = vtanh.f32 %v410_v27 }
 0x679   :  { %v838_v28 = vpop.eup %837 }
 0x67a   :  { %419 = vrot.lane.b32.xlu2 %v838_v28, %s886_s14  ;;  %v412_v29 = vmul.f32 0.5, %v838_v28 }
 0x67c   :  { %v413_v30 = vadd.f32 0.5, %v412_v29 }
 0x67e   :  { %v417_v34 = vmul.f32 %v415_v33, %v413_v30 }
 0x6d4   :  { %v420_v31 = vpop.permute.xlu2 %419 }
 0x6d5   :  { %v422_v32 = vmul.f32 %v420_v31, %v413_v30 }
 0x6d7   :  { %424 = vrot.lane.b32.xlu0 %v422_v32, %s887_s15 }
 0x749   :  { %v425_v35 = vpop.permute.xlu0 %424 }
 0x74a   :  { %v427_v36 = vadd.f32 %v425_v35, %v417_v34 }
 0x74c   :  { %839 = vtanh.f32 %v427_v36  ;;  %v468_v50 = vrot.slane %v427_v36, 6 }
 0x752   :  { %v840_v37 = vpop.eup %839 }
 0x753   :  { %430 = vrot.lane.b32.xlu1 %v840_v37, %s886_s14 }
 0x7c5   :  { %v431_v38 = vpop.permute.xlu1 %430 }
 0x7c6   :  { %v433_v39 = vmul.f32 %v431_v38, %v413_v30 }
 0x7c8   :  { %v435_v40 = vrot.slane %v433_v39, 4 }
 0x7ca   :  { %436 = vrot.lane.b32.xlu2 %v435_v40, %s887_s15 }
 0x824   :  { %v437_v41 = vpop.permute.xlu2 %436 }
 0x825   :  { %796 = vmatmul.msk.f32.vlgmr.msra.gmra.mxu1 %vm284_vm4, %v437_v41 }
 0x8a2   :  { %v457_v42 = vpop.f32.mrf.mxu1 }
 0x8a3   :  { %v461_v43 = vrot.slane %v457_v42, 2 }
 0x8a5   :  { %v463_v44 = vadd.f32 %v461_v43, %v1059_v57 }
 0x8a7   :  { %841 = vtanh.f32 %v463_v44 }
 0x8ad   :  { %v842_v45 = vpop.eup %841 }
 0x8ae   :  { %472 = vrot.lane.b32.xlu0 %v842_v45, %s886_s14  ;;  %v465_v46 = vmul.f32 0.5, %v842_v45 }
 0x8b0   :  { %v466_v47 = vadd.f32 0.5, %v465_v46 }
 0x8b2   :  { %v470_v51 = vmul.f32 %v468_v50, %v466_v47 }
 0x920   :  { %v473_v48 = vpop.permute.xlu0 %472 }
 0x921   :  { %v475_v49 = vmul.f32 %v473_v48, %v466_v47 }
 0x923   :  { %477 = vrot.lane.b32.xlu1 %v475_v49, %s887_s15 }
 0x995   :  { %v478_v52 = vpop.permute.xlu1 %477 }
 0x996   :  { %v480_v53 = vadd.f32 %v478_v52, %v470_v51 }
 0x998   :  { %843 = vtanh.f32 %v480_v53  ;;  %v518_v3 = vrot.slane %v480_v53, 6 }
 0x99e   :  { %v844_v54 = vpop.eup %843 }
 0x99f   :  { %483 = vrot.lane.b32.xlu2 %v844_v54, %s886_s14 }
 0x9f9   :  { %v484_v55 = vpop.permute.xlu2 %483 }
 0x9fa   :  { %v486_v57 = vmul.f32 %v484_v55, %v466_v47 }
 0x9fc   :  { %v488_v58 = vrot.slane %v486_v57, 6 }
 0x9fe   :  { %489 = vrot.lane.b32.xlu0 %v488_v58, %s887_s15 }
 0xa70   :  { %v490_v59 = vpop.permute.xlu0 %489 }
 0xa71   :  { %797 = vmatmul.msk.f32.vlgmr.msrb.gmra.mxu3 %vm284_vm4, %v490_v59 }
 0xaf4   :  { %v510_v60 = vpop.f32.mrf.mxu3 }
 0xaf5   :  { %v513_v61 = vadd.f32 %v510_v60, %v1057_v56 }
 0xaf7   :  { %845 = vtanh.f32 %v513_v61 }
 0xafd   :  { %v846_v62 = vpop.eup %845 }
 0xafe   :  { %522 = vrot.lane.b32.xlu1 %v846_v62, %s886_s14  ;;  %v515_v63 = vmul.f32 0.5, %v846_v62 }
 0xb00   :  { %v516_v0 = vadd.f32 0.5, %v515_v63 }
 0xb02   :  { %v520_v4 = vmul.f32 %v518_v3, %v516_v0 }
 0xb70   :  { %v523_v1 = vpop.permute.xlu1 %522 }
 0xb71   :  { %v525_v2 = vmul.f32 %v523_v1, %v516_v0 }
 0xb73   :  { %527 = vrot.lane.b32.xlu2 %v525_v2, %s887_s15 }
 0xbcd   :  { %v528_v5 = vpop.permute.xlu2 %527 }
 0xbce   :  { %v530_v6 = vadd.f32 %v528_v5, %v520_v4 }
 0xbd0   :  { %847 = vtanh.f32 %v530_v6  ;;  %v570_v19 = vrot.slane %v530_v6, 6 }
 0xbd6   :  { %v848_v7 = vpop.eup %847 }
 0xbd7   :  { %533 = vrot.lane.b32.xlu0 %v848_v7, %s886_s14 }
 0xc49   :  { %v534_v8 = vpop.permute.xlu0 %533 }
 0xc4a   :  { %v536_v9 = vmul.f32 %v534_v8, %v516_v0 }
 0xc4c   :  { %538 = vrot.lane.b32.xlu1 %v536_v9, %s887_s15 }
 0xcbe   :  { %v539_v10 = vpop.permute.xlu1 %538 }
 0xcbf   :  { %798 = vmatmul.msk.f32.vlgmr.msrb.gmra.mxu1 %vm284_vm4, %v539_v10 }
 0xd3c   :  { %v559_v11 = vpop.f32.mrf.mxu1 }
 0xd3d   :  { %v563_v12 = vrot.slane %v559_v11, 6 }
 0xd3f   :  { %v565_v13 = vadd.f32 %v563_v12, %v1057_v56 }
 0xd41   :  { %849 = vtanh.f32 %v565_v13 }
 0xd47   :  { %v850_v14 = vpop.eup %849 }
 0xd48   :  { %574 = vrot.lane.b32.xlu2 %v850_v14, %s886_s14  ;;  %v567_v15 = vmul.f32 0.5, %v850_v14 }
 0xd4a   :  { %v568_v16 = vadd.f32 0.5, %v567_v15 }
 0xd4c   :  { %v572_v20 = vmul.f32 %v570_v19, %v568_v16 }
 0xda2   :  { %v575_v17 = vpop.permute.xlu2 %574 }
 0xda3   :  { %v577_v18 = vmul.f32 %v575_v17, %v568_v16 }
 0xda5   :  { %579 = vrot.lane.b32.xlu0 %v577_v18, %s887_s15 }
 0xe17   :  { %v580_v21 = vpop.permute.xlu0 %579 }
 0xe18   :  { %v582_v22 = vadd.f32 %v580_v21, %v572_v20 }
 0xe1a   :  { %851 = vtanh.f32 %v582_v22  ;;  %v623_v36 = vrot.slane %v582_v22, 6 }
 0xe20   :  { %v852_v23 = vpop.eup %851 }
 0xe21   :  { %585 = vrot.lane.b32.xlu1 %v852_v23, %s886_s14 }
 0xe93   :  { %v586_v24 = vpop.permute.xlu1 %585 }
 0xe94   :  { %v588_v25 = vmul.f32 %v586_v24, %v568_v16 }
 0xe96   :  { %v590_v26 = vrot.slane %v588_v25, 2 }
 0xe98   :  { %591 = vrot.lane.b32.xlu2 %v590_v26, %s887_s15 }
 0xef2   :  { %v592_v27 = vpop.permute.xlu2 %591 }
 0xef3   :  { %799 = vmatmul.msk.f32.vlgmr.msrb.gmra.mxu2 %vm284_vm4, %v592_v27 }
 0xf76   :  { %v612_v28 = vpop.f32.mrf.mxu2 }
 0xf77   :  { %v616_v29 = vrot.slane %v612_v28, 4 }
 0xf79   :  { %v618_v30 = vadd.f32 %v616_v29, %v1057_v56 }
 0xf7b   :  { %853 = vtanh.f32 %v618_v30 }
 0xf81   :  { %v854_v31 = vpop.eup %853 }
 0xf82   :  { %627 = vrot.lane.b32.xlu0 %v854_v31, %s886_s14  ;;  %v620_v32 = vmul.f32 0.5, %v854_v31 }
 0xf84   :  { %v621_v33 = vadd.f32 0.5, %v620_v32 }
 0xf86   :  { %v625_v37 = vmul.f32 %v623_v36, %v621_v33 }
 0xff4   :  { %v628_v34 = vpop.permute.xlu0 %627 }
 0xff5   :  { %v630_v35 = vmul.f32 %v628_v34, %v621_v33 }
 0xff7   :  { %632 = vrot.lane.b32.xlu1 %v630_v35, %s887_s15 }
0x1069   :  { %v633_v38 = vpop.permute.xlu1 %632 }
0x106a   :  { %v635_v39 = vadd.f32 %v633_v38, %v625_v37 }
0x106c   :  { %855 = vtanh.f32 %v635_v39  ;;  %v676_v53 = vrot.slane %v635_v39, 6 }
0x1072   :  { %v856_v40 = vpop.eup %855 }
0x1073   :  { %638 = vrot.lane.b32.xlu2 %v856_v40, %s886_s14 }
0x10cd   :  { %v639_v41 = vpop.permute.xlu2 %638 }
0x10ce   :  { %v641_v42 = vmul.f32 %v639_v41, %v621_v33 }
0x10d0   :  { %v643_v43 = vrot.slane %v641_v42, 4 }
0x10d2   :  { %644 = vrot.lane.b32.xlu0 %v643_v43, %s887_s15 }
0x1144   :  { %v645_v44 = vpop.permute.xlu0 %644 }
0x1145   :  { %800 = vmatmul.msk.f32.vlgmr.msra.gmra.mxu3 %vm284_vm4, %v645_v44 }
0x11c8   :  { %v665_v45 = vpop.f32.mrf.mxu3 }
0x11c9   :  { %v669_v46 = vrot.slane %v665_v45, 2 }
0x11cb   :  { %v671_v47 = vadd.f32 %v669_v46, %v1057_v56 }
0x11cd   :  { %857 = vtanh.f32 %v671_v47 }
0x11d3   :  { %v858_v48 = vpop.eup %857 }
0x11d4   :  { %680 = vrot.lane.b32.xlu1 %v858_v48, %s886_s14  ;;  %v673_v49 = vmul.f32 0.5, %v858_v48 }
0x11d6   :  { %v674_v50 = vadd.f32 0.5, %v673_v49 }
0x11d8   :  { %v678_v54 = vmul.f32 %v676_v53, %v674_v50 }
0x1246   :  { %v681_v51 = vpop.permute.xlu1 %680 }
0x1247   :  { %v683_v52 = vmul.f32 %v681_v51, %v674_v50 }
0x1249   :  { %685 = vrot.lane.b32.xlu2 %v683_v52, %s887_s15 }
0x12a3   :  { %v686_v55 = vpop.permute.xlu2 %685 }
0x12a4   :  { %v688_v57 = vadd.f32 %v686_v55, %v678_v54 }
0x12a6   :  { %690 = vrot.lane.b32.xlu0 %v688_v57, %s888_s7 }
0x1318   :  { %v691_v56 = vpop.permute.xlu0 %690 }
0x1319   :  { %694 = vst.msk [vmem:[#allocation2 - $0x6] sm:$0xc0] %vm693_vm5, %v691_v56 }
0x131a   :  { %705 = dma.vmem_to_hbm [thread:$0]  %s701_s17, 32, %s703_s19, [#allocation3]  }
0x131b   :  { %883 = dma.done.wait [#allocation3], 32  }
0x131c   :  { %884 = vsyncadd [#allocation3], 4294967264 }
0x131d   :  { %710 = vsyncpa [#allocation3], 1 }

</bundles_post_ra>
